<compile_context>
chip_gen: v7x
topology: tpu7x:2x2x1
jax: 0.10.0
libtpu: 0.0.40
codegen_flags: <defaults>
</compile_context>

<pallas_src>
import functools

import numpy as np
import jax
import jax.numpy as jnp
from jax.experimental import pallas as pl
from jax.experimental.pallas import tpu as pltpu

HIGH = jax.lax.Precision.HIGHEST  # only used in the pure-JAX reference path
_BF16_MAX = float(jnp.finfo(jnp.bfloat16).max)


# ----------------------------------------------------------------------------------
# Static (numpy) helpers, mirrors of the PyTorch helper functions
# ----------------------------------------------------------------------------------
def get_earth_position_index(window_size):
    win_pl, win_lat, win_lon = window_size
    coords_zi = np.arange(win_pl)
    coords_zj = -np.arange(win_pl) * win_pl
    coords_hi = np.arange(win_lat)
    coords_hj = -np.arange(win_lat) * win_lat
    coords_w = np.arange(win_lon)
    coords_1 = np.stack(np.meshgrid(coords_zi, coords_hi, coords_w, indexing="ij"))
    coords_2 = np.stack(np.meshgrid(coords_zj, coords_hj, coords_w, indexing="ij"))
    coords_flatten_1 = coords_1.reshape(3, -1)
    coords_flatten_2 = coords_2.reshape(3, -1)
    coords = coords_flatten_1[:, :, None] - coords_flatten_2[:, None, :]
    coords = coords.transpose(1, 2, 0).copy()
    coords[:, :, 2] += win_lon - 1
    coords[:, :, 1] *= 2 * win_lon - 1
    coords[:, :, 0] *= (2 * win_lon - 1) * win_lat * win_lat
    return coords.sum(-1)  # (N, N) int


def get_pad3d(input_resolution, window_size):
    Pl, Lat, Lon = input_resolution
    win_pl, win_lat, win_lon = window_size
    padding_left = padding_right = padding_top = padding_bottom = padding_front = padding_back = 0
    if Pl % win_pl:
        pl_pad = win_pl - Pl % win_pl
        padding_front = pl_pad // 2
        padding_back = pl_pad - padding_front
    if Lat % win_lat:
        lat_pad = win_lat - Lat % win_lat
        padding_top = lat_pad // 2
        padding_bottom = lat_pad - padding_top
    if Lon % win_lon:
        lon_pad = win_lon - Lon % win_lon
        padding_left = lon_pad // 2
        padding_right = lon_pad - padding_left
    return (padding_left, padding_right, padding_top, padding_bottom, padding_front, padding_back)


def window_partition(x, window_size):
    """x: (B, Pl, Lat, Lon, C) -> (B*num_lon, num_pl*num_lat, wpl, wlat, wlon, C). np or jnp."""
    B, Pl, Lat, Lon, C = x.shape
    win_pl, win_lat, win_lon = window_size
    x = x.reshape(B, Pl // win_pl, win_pl, Lat // win_lat, win_lat, Lon // win_lon, win_lon, C)
    windows = x.transpose((0, 5, 1, 3, 2, 4, 6, 7)).reshape(
        -1, (Pl // win_pl) * (Lat // win_lat), win_pl, win_lat, win_lon, C)
    return windows


def window_reverse(windows, window_size, Pl, Lat, Lon):
    win_pl, win_lat, win_lon = window_size
    B = windows.shape[0] // (Lon // win_lon)
    x = windows.reshape(B, Lon // win_lon, Pl // win_pl, Lat // win_lat, win_pl, win_lat, win_lon, -1)
    x = x.transpose((0, 2, 4, 3, 5, 1, 6, 7)).reshape(B, Pl, Lat, Lon, -1)
    return x


def get_shift_window_mask(input_resolution, window_size, shift_size):
    Pl, Lat, Lon = input_resolution
    win_pl, win_lat, win_lon = window_size
    shift_pl, shift_lat, shift_lon = shift_size
    img_mask = np.zeros((1, Pl, Lat, Lon + shift_lon, 1), dtype=np.float32)
    pl_slices = (slice(0, -win_pl), slice(-win_pl, -shift_pl), slice(-shift_pl, None))
    lat_slices = (slice(0, -win_lat), slice(-win_lat, -shift_lat), slice(-shift_lat, None))
    lon_slices = (slice(0, -win_lon), slice(-win_lon, -shift_lon), slice(-shift_lon, None))
    cnt = 0
    for pl_s in pl_slices:
        for lat_s in lat_slices:
            for lon_s in lon_slices:
                img_mask[:, pl_s, lat_s, lon_s, :] = cnt
                cnt += 1
    img_mask = img_mask[:, :, :, :Lon, :]
    mask_windows = window_partition(img_mask, window_size)
    mask_windows = mask_windows.reshape(mask_windows.shape[0], mask_windows.shape[1],
                                        win_pl * win_lat * win_lon)
    attn_mask = mask_windows[:, :, None, :] - mask_windows[:, :, :, None]
    attn_mask = np.where(attn_mask != 0, np.float32(-100.0), np.float32(0.0))
    return attn_mask  # (n_lon, n_pl*n_lat, N, N)


def crop3d_channels_last(x, resolution):
    _, Pl, Lat, Lon, _ = x.shape
    pl_pad, lat_pad, lon_pad = Pl - resolution[0], Lat - resolution[1], Lon - resolution[2]
    pf = pl_pad // 2
    pb = pl_pad - pf
    pt = lat_pad // 2
    pbt = lat_pad - pt
    plft = lon_pad // 2
    prt = lon_pad - plft
    return x[:, pf:Pl - pb, pt:Lat - pbt, plft:Lon - prt, :]


# ----------------------------------------------------------------------------------
# Small utilities
# ----------------------------------------------------------------------------------
def _gelu_tanh(x):
    # tanh-approximate GELU (EUP tanh instead of a VALU erf polynomial); f32 math.
    c = np.float32(np.sqrt(2.0 / np.pi))
    return 0.5 * x * (1.0 + jnp.tanh(c * (x + np.float32(0.044715) * x * x * x)))


def _row_tile(L, target=128):
    """Largest multiple-of-8 divisor of L that is <= target; falls back to L."""
    if L % 8 != 0:
        return L
    best = None
    for t in range(8, min(L, target) + 1, 8):
        if L % t == 0:
            best = t
    return best if best is not None else L


# ----------------------------------------------------------------------------------
# Pallas kernel 1: LayerNorm(eps=1e-10) + nan_to_num (norm1 path), bf16 output,
#   grid over (batch, L-tiles)
# ----------------------------------------------------------------------------------
def _norm1_kernel(x_ref, g_ref, b_ref, o_ref, *, eps):
    x = x_ref[0]  # (TL, C) f32
    mu = jnp.mean(x, axis=-1, keepdims=True)
    var = jnp.mean((x - mu) ** 2, axis=-1, keepdims=True)
    y = (x - mu) * jax.lax.rsqrt(var + eps) * g_ref[...] + b_ref[...]
    # torch.nan_to_num(y, 0): nan -> 0, +/-inf -> finite max/min.  Output is bf16, so clamp
    # to bf16 max (f32 max would overflow to inf after the cast).  Unreachable in practice.
    y = jnp.where(jnp.isnan(y), jnp.float32(0.0), y)
    y = jnp.where(y == jnp.inf, jnp.float32(_BF16_MAX), y)
    y = jnp.where(y == -jnp.inf, jnp.float32(-_BF16_MAX), y)
    o_ref[0] = y.astype(o_ref.dtype)


def norm1_pallas(x, g_r, b_r, eps):
    B, L, C = x.shape
    TL = _row_tile(L)
    nL = L // TL
    return pl.pallas_call(
        functools.partial(_norm1_kernel, eps=eps),
        out_shape=jax.ShapeDtypeStruct((B, L, C), jnp.bfloat16),
        grid=(B, nL),
        in_specs=[pl.BlockSpec((1, TL, C), lambda b, j: (b, j, 0)),
                  pl.BlockSpec((1, C), lambda b, j: (0, 0)),
                  pl.BlockSpec((1, C), lambda b, j: (0, 0))],
        out_specs=pl.BlockSpec((1, TL, C), lambda b, j: (b, j, 0)),
        compiler_params=pltpu.CompilerParams(
            dimension_semantics=("parallel", "parallel"),
            vmem_limit_bytes=48 * 1024 * 1024),
    )(x, g_r, b_r)


# ----------------------------------------------------------------------------------
# Pallas kernel 2: windowed MHA with fused (earth-position-bias + shift-mask) additive term.
#   grid=(nLon, B): the bias block index depends only on the lon coordinate, so it stays
#   VMEM resident across the (inner) batch loop.  One fused QKV matmul, one output-proj
#   matmul; qk scale and dt are folded into the weights at prepare time.
# ----------------------------------------------------------------------------------
def _attn_kernel(x_ref, wqkv_ref, bqkv_ref, wproj_ref, bproj_ref, bias_ref, o_ref, *, num_heads):
    _, nW, N, C = x_ref.shape
    nH = num_heads
    hd = C // nH
    T = nW * N

    x = x_ref[0].reshape(T, C)                                          # (T, C) bf16
    qkv = jnp.dot(x, wqkv_ref[...],
                  preferred_element_type=jnp.float32) + bqkv_ref[...]   # (T, 3C) f32

    def to_heads(m):                                                    # (T, C) -> (nH*nW, N, hd)
        m = m.astype(jnp.bfloat16)
        parts = [m[:, h * hd:(h + 1) * hd].reshape(nW, N, hd) for h in range(nH)]
        return jnp.concatenate(parts, axis=0)                           # head-major batch

    q = to_heads(qkv[:, :C])            # qk scale already folded into wqkv / bqkv
    k = to_heads(qkv[:, C:2 * C])
    v = to_heads(qkv[:, 2 * C:])

    # scores: batch (head, window), contract head_dim
    s = jax.lax.dot_general(q, k, (((2,), (2,)), ((0,), (0,))),
                            preferred_element_type=jnp.float32)         # (nH*nW, N, N)
    s = s + bias_ref[0].astype(jnp.float32)                             # fused bias + shift mask
    s = s - jnp.max(s, axis=-1, keepdims=True)
    e = jnp.exp(s)
    # NOTE: approx reciprocal -> softmax rows do not sum to exactly 1 (within ~1e-3).
    p = e * pl.reciprocal(jnp.sum(e, axis=-1, keepdims=True), approx=True)

    o = jax.lax.dot_general(p.astype(jnp.bfloat16), v, (((2,), (1,)), ((0,), (0,))),
                            preferred_element_type=jnp.float32)         # (nH*nW, N, hd)

    # re-concatenate heads along lanes -> single (T, C) @ (C, C) projection (dt folded in)
    o = o.astype(jnp.bfloat16)
    o_cat = jnp.concatenate([o[h * nW:(h + 1) * nW].reshape(T, hd) for h in range(nH)], axis=-1)
    y = jnp.dot(o_cat, wproj_ref[...],
                preferred_element_type=jnp.float32) + bproj_ref[...]    # (T, C) f32
    o_ref[0] = y.reshape(nW, N, C)


def attn_pallas(xw, p, cfg):
    B_, nW, N, C = xw.shape
    nH = cfg["num_heads"]
    bias = p["attn_bias"]                               # (nLonB, nH*nW, N, N) bf16
    nLonB = bias.shape[0]
    nLon = cfg["pad_resolution"][2] // cfg["window_size"][2]
    B = B_ // nLon
    HW = nH * nW

    x_map = lambda l, b: (b * nLon + l, 0, 0, 0)        # data is (batch, lon)-major
    if nLonB == 1:
        bias_map = lambda l, b: (0, 0, 0, 0)            # fully VMEM resident
    else:
        bias_map = lambda l, b: (l, 0, 0, 0)            # changes only with the (outer) lon index

    kernel = functools.partial(_attn_kernel, num_heads=nH)
    return pl.pallas_call(
        kernel,
        out_shape=jax.ShapeDtypeStruct((B_, nW, N, C), jnp.float32),
        grid=(nLon, B),
        in_specs=[
            pl.BlockSpec((1, nW, N, C), x_map),
            pl.BlockSpec((C, 3 * C), lambda l, b: (0, 0)),   # wqkv (bf16, scale folded)
            pl.BlockSpec((1, 3 * C), lambda l, b: (0, 0)),   # bqkv (f32, scale folded)
            pl.BlockSpec((C, C), lambda l, b: (0, 0)),       # wproj (bf16, dt folded)
            pl.BlockSpec((1, C), lambda l, b: (0, 0)),       # bproj (f32, dt folded)
            pl.BlockSpec((1, HW, N, N), bias_map),           # fused bias+mask (bf16)
        ],
        out_specs=pl.BlockSpec((1, nW, N, C), x_map),
        compiler_params=pltpu.CompilerParams(
            dimension_semantics=("parallel", "parallel"),
            vmem_limit_bytes=48 * 1024 * 1024),
    )(xw, p["wqkv_s"], p["bqkv_s"], p["wproj_dt"], p["bproj_dt"], bias)


# ----------------------------------------------------------------------------------
# Pallas kernel 3: fused attention-residual + norm2 + MLP(fc1 -> GELU -> fc2) + residual
#   out = x + mlp_dt(LN(x)),  x = shortcut + xo   (dt folded into proj / fc2 at prepare time)
#   grid over (batch, L-tiles)
# ----------------------------------------------------------------------------------
def _mlp_kernel(s_ref, xo_ref, g_ref, b_ref, w1_ref, b1_ref, w2_ref, b2_ref, o_ref, *, eps):
    x = s_ref[0] + xo_ref[0]                            # (TL, C) f32, fused residual (dt folded)
    mu = jnp.mean(x, axis=-1, keepdims=True)
    var = jnp.mean((x - mu) ** 2, axis=-1, keepdims=True)
    ln = (x - mu) * jax.lax.rsqrt(var + eps) * g_ref[...] + b_ref[...]
    h = jnp.dot(ln.astype(jnp.bfloat16), w1_ref[...],
                preferred_element_type=jnp.float32) + b1_ref[...]
    h = _gelu_tanh(h)
    y = jnp.dot(h.astype(jnp.bfloat16), w2_ref[...],
                preferred_element_type=jnp.float32) + b2_ref[...]       # dt folded into w2/b2
    o_ref[0] = x + y


def mlp_fused_pallas(shortcut, xo, p, eps):
    B, L, C = shortcut.shape
    H = p["w1_bf"].shape[1]
    TL = _row_tile(L)
    nL = L // TL
    kernel = functools.partial(_mlp_kernel, eps=eps)
    return pl.pallas_call(
        kernel,
        out_shape=jax.ShapeDtypeStruct((B, L, C), jnp.float32),
        grid=(B, nL),
        in_specs=[
            pl.BlockSpec((1, TL, C), lambda b, j: (b, j, 0)),
            pl.BlockSpec((1, TL, C), lambda b, j: (b, j, 0)),
            pl.BlockSpec((1, C), lambda b, j: (0, 0)),
            pl.BlockSpec((1, C), lambda b, j: (0, 0)),
            pl.BlockSpec((C, H), lambda b, j: (0, 0)),
            pl.BlockSpec((1, H), lambda b, j: (0, 0)),
            pl.BlockSpec((H, C), lambda b, j: (0, 0)),
            pl.BlockSpec((1, C), lambda b, j: (0, 0)),
        ],
        out_specs=pl.BlockSpec((1, TL, C), lambda b, j: (b, j, 0)),
        compiler_params=pltpu.CompilerParams(
            dimension_semantics=("parallel", "parallel"),
            vmem_limit_bytes=48 * 1024 * 1024),
    )(shortcut, xo, p["norm2_g_r"], p["norm2_b_r"],
      p["w1_bf"], p["b1_r"], p["w2_dt"], p["b2_dt"])


# ----------------------------------------------------------------------------------
# Pure-JAX f32 reference paths (correctness check only)
# ----------------------------------------------------------------------------------
def _layernorm_ref(x, g, b, eps):
    mu = jnp.mean(x, -1, keepdims=True)
    var = jnp.mean((x - mu) ** 2, -1, keepdims=True)
    return (x - mu) * jax.lax.rsqrt(var + eps) * g + b


def _attn_ref(xw, p, bias, mask, nH, scale):
    B_, nW, N, C = xw.shape
    hd = C // nH
    qkv = jnp.einsum("bwnc,cd->bwnd", xw, p["wqkv"], precision=HIGH) + p["bqkv"]
    qkv = qkv.reshape(B_, nW, N, 3, nH, hd).transpose((3, 0, 4, 1, 2, 5))
    q, k, v = qkv[0] * scale, qkv[1], qkv[2]                      # (B_, nH, nW, N, hd)
    a = jnp.einsum("bhwnd,bhwmd->bhwnm", q, k, precision=HIGH)
    a = a + bias[None]                                            # (nH, nW, N, N)
    nLonMask = mask.shape[0]
    a = a.reshape(B_ // nLonMask, nLonMask, nH, nW, N, N) + mask[None, :, None]
    a = a.reshape(B_, nH, nW, N, N)
    a = jax.nn.softmax(a, axis=-1)
    o = jnp.einsum("bhwnm,bhwmd->bhwnd", a, v, precision=HIGH)
    o = o.transpose((0, 2, 3, 1, 4)).reshape(B_, nW, N, C)
    return jnp.einsum("bwnc,cd->bwnd", o, p["wproj"], precision=HIGH) + p["bproj"]


def _mlp_ref(x, p, eps):
    ln = _layernorm_ref(x, p["norm2_g"], p["norm2_b"], eps)
    h = jax.nn.gelu(jnp.dot(ln, p["w1"], precision=HIGH) + p["b1"], approximate=False)
    return jnp.dot(h, p["w2"], precision=HIGH) + p["b2"]


# ----------------------------------------------------------------------------------
# Block / layer forward (glue)
# ----------------------------------------------------------------------------------
def block_forward(x, p, cfg, use_pallas=True):
    Pl, Lat, Lon = cfg["input_resolution"]
    win = cfg["window_size"]
    shift_pl, shift_lat, shift_lon = cfg["shift_size"]
    dim, nH, dt = cfg["dim"], cfg["num_heads"], cfg["dt"]
    B, L, C = x.shape
    assert L == Pl * Lat * Lon

    shortcut = x
    if use_pallas:
        xn = norm1_pallas(x, p["norm1_g_r"], p["norm1_b_r"], 1e-10)   # bf16 output
    else:
        xn = _layernorm_ref(x, p["norm1_g"], p["norm1_b"], 1e-10)
        xn = jnp.nan_to_num(xn, nan=0.0)
    # c is None -> no AdaLN modulation path; no axis_attn

    x5 = xn.reshape(B, Pl, Lat, Lon, C)
    pad_l, pad_r, pad_t, pad_b, pad_f, pad_bk = cfg["padding"]
    x5 = jnp.pad(x5, ((0, 0), (pad_f, pad_bk), (pad_t, pad_b), (pad_l, pad_r), (0, 0)))
    _, Pl_pad, Lat_pad, Lon_pad, _ = x5.shape

    roll = bool(shift_pl and shift_lon and shift_lat)
    if roll:
        # NOTE: replicates the PyTorch reference exactly: third shift is -shift_lat (not -shift_lon)
        shifted = jnp.roll(x5, shift=(-shift_pl, -shift_lat, -shift_lat), axis=(1, 2, 3))
    else:
        shifted = x5

    xw = window_partition(shifted, win)
    win_pl, win_lat, win_lon = win
    N = win_pl * win_lat * win_lon
    xw = xw.reshape(xw.shape[0], xw.shape[1], N, C)

    if use_pallas:
        aw = attn_pallas(xw, p, cfg)                 # dt already folded into the projection
    else:
        scale = (dim // nH) ** -0.5
        toW = cfg["type_of_windows"]
        eb = p["bias_table"][cfg["pos_index"].reshape(-1)]
        eb = eb.reshape(N, N, toW, nH).transpose((3, 2, 0, 1))      # (nH, toW, N, N)
        mask = (cfg["attn_mask"] if cfg["attn_mask"] is not None
                else jnp.zeros((1, toW, N, N), jnp.float32))
        aw = _attn_ref(xw, p, eb, mask, nH, scale)

    aw = aw.reshape(aw.shape[0], aw.shape[1], win_pl, win_lat, win_lon, C)
    shifted = window_reverse(aw, win, Pl_pad, Lat_pad, Lon_pad)
    if roll:
        xo = jnp.roll(shifted, shift=(shift_pl, shift_lat, shift_lon), axis=(1, 2, 3))
    else:
        xo = shifted
    xo = crop3d_channels_last(xo, (Pl, Lat, Lon)).reshape(B, Pl * Lat * Lon, C)

    if use_pallas:
        # residual (shortcut + dt*attn, dt folded) is fused into the MLP kernel
        x = mlp_fused_pallas(shortcut, xo, p, 1e-5)
    else:
        x = shortcut + dt * xo
        x = x + dt * _mlp_ref(x, p, 1e-5)
    return x


def basic_layer_forward(x, params_list, cfg_list, use_pallas=True):
    for p, cfg in zip(params_list, cfg_list):
        x = block_forward(x, p, cfg, use_pallas=use_pallas)
    return x


# ----------------------------------------------------------------------------------
# Config / parameter construction and one-time kernel-side preprocessing
# ----------------------------------------------------------------------------------
def make_block_cfg(dim, input_resolution, num_heads, window_size, shift_size, dt=1.0):
    padding = get_pad3d(input_resolution, window_size)
    pad_res = (input_resolution[0] + padding[4] + padding[5],
               input_resolution[1] + padding[2] + padding[3],
               input_resolution[2] + padding[0] + padding[1])
    type_of_windows = (pad_res[0] // window_size[0]) * (pad_res[1] // window_size[1])
    pos_index = jnp.asarray(get_earth_position_index(window_size), jnp.int32)
    roll = bool(shift_size[0] and shift_size[2] and shift_size[1])
    attn_mask = (jnp.asarray(get_shift_window_mask(pad_res, window_size, shift_size), jnp.float32)
                 if roll else None)
    return dict(dim=dim, input_resolution=input_resolution, num_heads=num_heads,
                window_size=window_size, shift_size=shift_size, padding=padding,
                pad_resolution=pad_res, type_of_windows=type_of_windows,
                pos_index=pos_index, attn_mask=attn_mask, dt=dt)


def init_block_params(key, dim, num_heads, window_size, type_of_windows, mlp_hidden):
    ks = jax.random.split(key, 12)
    n_bias = window_size[0] ** 2 * window_size[1] ** 2 * (window_size[2] * 2 - 1)
    f32 = jnp.float32
    p = {
        "norm1_g": (1.0 + 0.02 * jax.random.normal(ks[0], (dim,))).astype(f32),
        "norm1_b": (0.02 * jax.random.normal(ks[1], (dim,))).astype(f32),
        "bias_table": (0.02 * jax.random.normal(ks[2], (n_bias, type_of_windows, num_heads))).astype(f32),
        "wqkv": (jax.random.normal(ks[3], (dim, 3 * dim)) / np.sqrt(dim)).astype(f32),
        "bqkv": (0.02 * jax.random.normal(ks[4], (3 * dim,))).astype(f32),
        "wproj": (jax.random.normal(ks[5], (dim, dim)) / np.sqrt(dim)).astype(f32),
        "bproj": (0.02 * jax.random.normal(ks[6], (dim,))).astype(f32),
        "norm2_g": (1.0 + 0.02 * jax.random.normal(ks[7], (dim,))).astype(f32),
        "norm2_b": (0.02 * jax.random.normal(ks[8], (dim,))).astype(f32),
        "w1": (jax.random.normal(ks[9], (dim, mlp_hidden)) / np.sqrt(dim)).astype(f32),
        "b1": (0.02 * jax.random.normal(ks[10], (mlp_hidden,))).astype(f32),
        "w2": (jax.random.normal(ks[11], (mlp_hidden, dim)) / np.sqrt(mlp_hidden)).astype(f32),
        "b2": jnp.zeros((dim,), f32),
    }
    return p


def prepare_block_params(p, cfg):
    """One-time preprocessing hoisted out of the forward pass:
       * qk `scale` folded into the q columns of the fused wqkv / bqkv (bf16 weights),
       * scalar `dt` folded into wproj/bproj and w2/b2,
       * fused (earth-position-bias + shift-mask) additive tensor in bf16,
       * reshaped LayerNorm / bias vectors.
       The raw f32 parameters stay in the dict for the pure-JAX reference path."""
    dim, nH, dt = cfg["dim"], cfg["num_heads"], float(cfg["dt"])
    hd = dim // nH
    win_pl, win_lat, win_lon = cfg["window_size"]
    N = win_pl * win_lat * win_lon
    toW = cfg["type_of_windows"]
    scale = hd ** -0.5
    f32, bf16 = jnp.float32, jnp.bfloat16
    q = dict(p)

    # fused QKV weight with qk scale folded into the q columns
    col_scale = jnp.concatenate([jnp.full((dim,), scale, f32), jnp.ones((2 * dim,), f32)])
    q["wqkv_s"] = (p["wqkv"] * col_scale[None, :]).astype(bf16)            # (C, 3C)
    q["bqkv_s"] = (p["bqkv"] * col_scale).reshape(1, 3 * dim).astype(f32)  # (1, 3C)
    # dt folded into the output projection and fc2 (dt is a python scalar in this module)
    q["wproj_dt"] = (p["wproj"] * dt).astype(bf16)
    q["bproj_dt"] = (p["bproj"] * dt).reshape(1, dim).astype(f32)
    q["w1_bf"] = p["w1"].astype(bf16)
    q["b1_r"] = p["b1"].reshape(1, -1).astype(f32)
    q["w2_dt"] = (p["w2"] * dt).astype(bf16)
    q["b2_dt"] = (p["b2"] * dt).reshape(1, dim).astype(f32)
    q["norm1_g_r"] = p["norm1_g"].reshape(1, dim)
    q["norm1_b_r"] = p["norm1_b"].reshape(1, dim)
    q["norm2_g_r"] = p["norm2_g"].reshape(1, dim)
    q["norm2_b_r"] = p["norm2_b"].reshape(1, dim)

    # fused earth-position bias + shift mask: (nLonB, nH*toW, N, N), bf16
    eb = p["bias_table"][cfg["pos_index"].reshape(-1)]            # (N*N, toW, nH)
    eb = eb.reshape(N, N, toW, nH).transpose((3, 2, 0, 1))        # (nH, toW, N, N)
    if cfg["attn_mask"] is not None:
        mask = cfg["attn_mask"]                                   # (nLon, toW, N, N)
        full = eb[None, :, :, :, :] + mask[:, None, :, :, :]      # (nLon, nH, toW, N, N)
    else:
        full = eb[None]                                           # (1, nH, toW, N, N)
    q["attn_bias"] = full.reshape(full.shape[0], nH * toW, N, N).astype(bf16)
    return q


# ----------------------------------------------------------------------------------
if __name__ == "__main__":
    dim = 32
    num_heads = 4
    input_resolution = (3, 6, 12)      # (Pl, Lat, Lon) -> padded to (4, 8, 16)
    window_size = (2, 4, 8)
    depth = 2                          # block 0: no shift; block 1: shift (1, 3, 6)
    mlp_ratio = 4.0
    B = 2
    L = input_resolution[0] * input_resolution[1] * input_resolution[2]

    key = jax.random.PRNGKey(0)
    kx, kp = jax.random.split(key)
    x = jax.random.normal(kx, (B, L, dim), jnp.float32)

    cfg_list, params_list = [], []
    pkeys = jax.random.split(kp, depth)
    for i in range(depth):
        shift = (0, 0, 0) if i % 2 == 0 else (1, 3, 6)
        cfg = make_block_cfg(dim, input_resolution, num_heads, window_size, shift, dt=1.0)
        cfg_list.append(cfg)
        raw = init_block_params(pkeys[i], dim, num_heads, window_size,
                                cfg["type_of_windows"], int(dim * mlp_ratio))
        params_list.append(prepare_block_params(raw, cfg))

    out = basic_layer_forward(x, params_list, cfg_list, use_pallas=True)
    out = jax.block_until_ready(out)

    ref = basic_layer_forward(x, params_list, cfg_list, use_pallas=False)
    ref = jax.block_until_ready(ref)

    assert out.shape == (B, L, dim)
    assert bool(jnp.all(jnp.isfinite(out)))
    # Tolerance accounts for bf16 MXU matmuls, bf16 bias/activations, tanh GELU and the
    # approximate softmax reciprocal vs. the f32 HIGHEST-precision reference, over 2 blocks.
    max_err = float(jnp.max(jnp.abs(out - ref)))
    rel_fro = float(jnp.linalg.norm(out - ref) / (jnp.linalg.norm(ref) + 1e-12))
    assert max_err < 2.5e-1, f"Pallas vs reference max abs mismatch: {max_err}"
    assert rel_fro < 3e-2, f"Pallas vs reference relative Frobenius mismatch: {rel_fro}"
    print("KERNEL_OK")
</pallas_src>

<mosaic_0001>
module attributes {stable_mosaic.version = 11 : i64} {
  func.func @_norm1_kernel(%arg0: i32, %arg1: i32, %arg2: memref<1x72x32xf32, #tpu.memory_space<vmem>>, %arg3: memref<1x32xf32, #tpu.memory_space<vmem>>, %arg4: memref<1x32xf32, #tpu.memory_space<vmem>>, %arg5: memref<1x72x32xbf16, #tpu.memory_space<vmem>>) attributes {dimension_semantics = [#tpu.dimension_semantics<parallel>, #tpu.dimension_semantics<parallel>], iteration_bounds = array<i64: 2, 3>, scalar_prefetch = 0 : i64, scratch_operands = 0 : i64, tpu.core_type = #tpu.core_type<tc>, window_params = [{transform_indices = @transform_0, window_bounds = array<i64: 1, 72, 32>}, {pipeline_mode = #tpu.pipeline_mode<synchronous>, transform_indices = @transform_1, window_bounds = array<i64: 1, 32>}, {pipeline_mode = #tpu.pipeline_mode<synchronous>, transform_indices = @transform_2, window_bounds = array<i64: 1, 32>}, {transform_indices = @transform_3, window_bounds = array<i64: 1, 72, 32>}]} {
    %c0 = arith.constant 0 : index
    %c0_0 = arith.constant 0 : index
    %c0_1 = arith.constant 0 : index
    %0 = vector.load %arg2[%c0, %c0_0, %c0_1] : memref<1x72x32xf32, #tpu.memory_space<vmem>>, vector<1x72x32xf32>
    %1 = vector.shape_cast %0 : vector<1x72x32xf32> to vector<72x32xf32>
    %cst = arith.constant dense<0.000000e+00> : vector<72xf32>
    %2 = vector.multi_reduction <add>, %1, %cst [1] : vector<72x32xf32> to vector<72xf32>
    %3 = vector.shape_cast %2 : vector<72xf32> to vector<72x1xf32>
    %cst_2 = arith.constant 3.200000e+01 : f32
    %4 = vector.broadcast %cst_2 : f32 to vector<72x1xf32>
    %5 = arith.divf %3, %4 : vector<72x1xf32>
    %6 = vector.broadcast %5 : vector<72x1xf32> to vector<72x32xf32>
    %7 = arith.subf %1, %6 : vector<72x32xf32>
    %8 = arith.mulf %7, %7 : vector<72x32xf32>
    %cst_3 = arith.constant dense<0.000000e+00> : vector<72xf32>
    %9 = vector.multi_reduction <add>, %8, %cst_3 [1] : vector<72x32xf32> to vector<72xf32>
    %10 = vector.shape_cast %9 : vector<72xf32> to vector<72x1xf32>
    %cst_4 = arith.constant 3.200000e+01 : f32
    %11 = vector.broadcast %cst_4 : f32 to vector<72x1xf32>
    %12 = arith.divf %10, %11 : vector<72x1xf32>
    %13 = vector.broadcast %5 : vector<72x1xf32> to vector<72x32xf32>
    %14 = arith.subf %1, %13 : vector<72x32xf32>
    %cst_5 = arith.constant 1.000000e-10 : f32
    %15 = vector.broadcast %cst_5 : f32 to vector<72x1xf32>
    %16 = arith.addf %12, %15 : vector<72x1xf32>
    %17 = math.rsqrt %16 : vector<72x1xf32>
    %18 = vector.broadcast %17 : vector<72x1xf32> to vector<72x32xf32>
    %19 = arith.mulf %14, %18 : vector<72x32xf32>
    %c0_6 = arith.constant 0 : index
    %c0_7 = arith.constant 0 : index
    %20 = vector.load %arg3[%c0_6, %c0_7] : memref<1x32xf32, #tpu.memory_space<vmem>>, vector<1x32xf32>
    %21 = vector.broadcast %20 : vector<1x32xf32> to vector<72x32xf32>
    %22 = arith.mulf %19, %21 : vector<72x32xf32>
    %c0_8 = arith.constant 0 : index
    %c0_9 = arith.constant 0 : index
    %23 = vector.load %arg4[%c0_8, %c0_9] : memref<1x32xf32, #tpu.memory_space<vmem>>, vector<1x32xf32>
    %24 = vector.broadcast %23 : vector<1x32xf32> to vector<72x32xf32>
    %25 = arith.addf %22, %24 : vector<72x32xf32>
    %26 = arith.cmpf one, %25, %25 : vector<72x32xf32>
    %cst_10 = arith.constant 0.000000e+00 : f32
    %27 = vector.broadcast %cst_10 : f32 to vector<72x32xf32>
    %28 = arith.select %26, %27, %25 : vector<72x32xi1>, vector<72x32xf32>
    %cst_11 = arith.constant 0x7F800000 : f32
    %29 = vector.broadcast %cst_11 : f32 to vector<72x32xf32>
    %30 = arith.cmpf oeq, %28, %29 : vector<72x32xf32>
    %cst_12 = arith.constant 3.38953139E+38 : f32
    %31 = vector.broadcast %cst_12 : f32 to vector<72x32xf32>
    %32 = arith.select %30, %31, %28 : vector<72x32xi1>, vector<72x32xf32>
    %cst_13 = arith.constant 0xFF800000 : f32
    %33 = vector.broadcast %cst_13 : f32 to vector<72x32xf32>
    %34 = arith.cmpf oeq, %32, %33 : vector<72x32xf32>
    %cst_14 = arith.constant -3.38953139E+38 : f32
    %35 = vector.broadcast %cst_14 : f32 to vector<72x32xf32>
    %36 = arith.select %34, %35, %32 : vector<72x32xi1>, vector<72x32xf32>
    %37 = arith.truncf %36 : vector<72x32xf32> to vector<72x32xbf16>
    %c0_15 = arith.constant 0 : index
    %c0_16 = arith.constant 0 : index
    %c0_17 = arith.constant 0 : index
    %38 = vector.load %arg5[%c0_15, %c0_16, %c0_17] : memref<1x72x32xbf16, #tpu.memory_space<vmem>>, vector<1x72x32xbf16>
    %39 = vector.shape_cast %38 : vector<1x72x32xbf16> to vector<72x32xbf16>
    %40 = vector.shape_cast %37 : vector<72x32xbf16> to vector<1x72x32xbf16>
    tpu.vector_store %arg5[%c0_15, %c0_16, %c0_17], %40 {strides = array<i32>} : memref<1x72x32xbf16, #tpu.memory_space<vmem>>, vector<1x72x32xbf16>,
    return
  }
  func.func @transform_0(%arg0: i32, %arg1: i32) -> (i32, i32, i32) {
    %c0_i32 = arith.constant 0 : i32
    %c0_i32_0 = arith.constant 0 : i32
    return %arg0, %arg1, %c0_i32 : i32, i32, i32
  }
  func.func @transform_1(%arg0: i32, %arg1: i32) -> (i32, i32) {
    %c0_i32 = arith.constant 0 : i32
    %c0_i32_0 = arith.constant 0 : i32
    %c0_i32_1 = arith.constant 0 : i32
    return %c0_i32, %c0_i32_0 : i32, i32
  }
  func.func @transform_2(%arg0: i32, %arg1: i32) -> (i32, i32) {
    %c0_i32 = arith.constant 0 : i32
    %c0_i32_0 = arith.constant 0 : i32
    %c0_i32_1 = arith.constant 0 : i32
    return %c0_i32, %c0_i32_0 : i32, i32
  }
  func.func @transform_3(%arg0: i32, %arg1: i32) -> (i32, i32, i32) {
    %c0_i32 = arith.constant 0 : i32
    %c0_i32_0 = arith.constant 0 : i32
    return %arg0, %arg1, %c0_i32 : i32, i32, i32
  }
}

</mosaic_0001>

<bundles_post_ra>
// kernel: tpu_custom_call.1
= control target key start
LH: loop header
LB: loop body
LE: loop exit
PB: predicated region body
PF: predicated region fallthrough
CT: control target
= control target key end

     0   :  { %s709_s12 = smov 0   ;;  %s711_s13 = smov 0   ;;  %s875_s0 = inlined_call_operand.vmem [shape: f32[2,216,32], index: 0, kind: input, shape index: {}]   ;;  %s876_s1 = inlined_call_operand.vmem [shape: f32[1,32], index: 1, kind: input, shape index: {}]   ;;  %s877_s2 = inlined_call_operand.vmem [shape: f32[1,32], index: 2, kind: input, shape index: {}]   ;;  %s878_s3 = inlined_call_operand.vmem [shape: bf16[2,216,32], index: 3, kind: output, shape index: {}]  }
   0x1   :  { %s713_s14 = smov 0   ;;  %s715_s15 = smov 0  }
   0x2   :  { %s717_s16 = smov 0  }
   0x3 LB: > { %s22_s17 = sadd.s32 1, %s679_s14  ;;  %s25_s18 = sadd.s32 1, %s683_s15  ;;  %s687_s16 = sphi %s717_s16, %s13_s16   ;;  %s683_s15 = sphi %s715_s15, %s882_s15   ;;  %s679_s14 = sphi %s713_s14, %s881_s14   ;;  %s675_s13 = sphi %s711_s13, %s880_s13   ;;  %s671_s12 = sphi %s709_s12, %s879_s12  }
   0x4   : > { %p23_p0 = scmp.ge.s32.totalorder %s22_s17, 3  ;;  %p565_p1 = scmp.ge.s32.totalorder %s687_s16, 1 }
   0x5   : > { %p158_p2 = scmp.lt.s32.totalorder %s687_s16, 7 }
   0x6   : > { %s884_s17 = smov (%p23_p0, %s22_s17), 0  ;;  %s886_s18 = smov (!%p23_p0, %s25_s18), %s683_s15 }
   0x7   : > { %p159_p3 = pnand %p565_p1, %p158_p2  ;;  %p27_p4 = scmp.ge.s32.totalorder %s886_s18, 2 }
   0x8   : > { %s190_s19 = smul.u32 (!%p159_p3), 9, %s671_s12  ;;  %p191_p5 = scmp.lt.s32.totalorder (!%p159_p3), %s675_s13, 1  ;;  %vm219_vm0 = vcmask (!%p159_p3), 261120   ;;  %vm461_vm3 = vcmask (!%p159_p3), 257024  }
   0x9   : > { %s888_s18 = smov (%p27_p4, %s886_s18), 0  ;;  %162 = sbr.rel (%p159_p3) target bundleno = 364 (0x16c), region = 32 }
   0xa   : > { %p193_p6 = scmp.lt.s32.totalorder (!%p159_p3), %s190_s19, 26 }
  0x10   : > { %s890_s13 = smov (!%p191_p5, %s675_s13), 1  ;;  %s892_s19 = smov (!%p193_p6, %s190_s19), 26 }
  0x11   : > { %s590_s20 = smul.u32 27, %s890_s13 }
  0x13   : > { %s739_s21 = sadd.s32 %s590_s20, %s892_s19 }
  0x14   : > { %s566_s22 = sshll.u32 %s739_s21, 3  ;;  %s567_s30 = sshll.u32 %s739_s21, 2 }
  0x15   : > { %s198_s25 = scalar_lea.vmem %s875_s0, %s566_s22  ;;  %s825_s6 = scalar_lea.vmem %s878_s3, %s567_s30 }
  0x16   : > { %v210_v0 = vld [vmem:[%s198_s25] sm:$0xff]  ;;  %v212_v1 = vld [vmem:[%s198_s25 + $0x10] sm:$0xff]  ;;  %v211_v2 = vld [vmem:[%s198_s25 + $0x8] sm:$0xff] }
  0x17   : > { %v220_v3 = vsel %vm219_vm0, %v210_v0, 0.0  ;;  %v226_v4 = vsel %vm219_vm0, %v212_v1, 0.0  ;;  %v213_v5 = vld [vmem:[%s198_s25 + $0x18] sm:$0xff]  ;;  %v223_v6 = vsel %vm219_vm0, %v211_v2, 0.0  ;;  %v214_v8 = vld [vmem:[%s198_s25 + $0x20] sm:$0xff]  ;;  %v215_v9 = vld [vmem:[%s198_s25 + $0x28] sm:$0xff] }
  0x18   : > { %221 = vadd.xlane.f32.xlu0 %v220_v3  ;;  %227 = vadd.xlane.f32.xlu1 %v226_v4  ;;  %v229_v7 = vsel %vm219_vm0, %v213_v5, 0.0  ;;  %v232_v10 = vsel %vm219_vm0, %v214_v8, 0.0  ;;  %v235_v11 = vsel %vm219_vm0, %v215_v9, 0.0  ;;  %v216_v12 = vld [vmem:[%s198_s25 + $0x30] sm:$0xff]  ;;  %v217_v13 = vld [vmem:[%s198_s25 + $0x38] sm:$0xff]  ;;  %v218_v16 = vld [vmem:[%s198_s25 + $0x40] sm:$0xff] }
  0x19   : > { %v238_v14 = vsel %vm219_vm0, %v216_v12, 0.0  ;;  %v241_v15 = vsel %vm219_vm0, %v217_v13, 0.0  ;;  %v244_v17 = vsel %vm219_vm0, %v218_v16, 0.0 }
  0x1c   : > { %224 = vadd.xlane.f32.xlu0 %v223_v6  ;;  %230 = vadd.xlane.f32.xlu1 %v229_v7 }
  0x20   : > { %233 = vadd.xlane.f32.xlu0 %v232_v10  ;;  %236 = vadd.xlane.f32.xlu1 %v235_v11 }
  0x24   : > { %239 = vadd.xlane.f32.xlu0 %v238_v14  ;;  %242 = vadd.xlane.f32.xlu1 %v241_v15 }
  0x28   : > { %245 = vadd.xlane.f32.xlu0 %v244_v17 }
  0xa5   : > { %v222_v18 = vpop.xlane.xlu0 %221  ;;  %v228_v19 = vpop.xlane.xlu1 %227 }
  0xa6   : > { %v248_v20 = vmul.f32 0.03125, %v222_v18  ;;  %v250_v21 = vmul.f32 0.03125, %v228_v19  ;;  %v802_v19 = vld [vmem:[%s876_s1] ss:$0 sm:$0xff] }
  0xa8   : > { %v754_v22 = vsub.f32 %v210_v0, %v248_v20  ;;  %v756_v23 = vsub.f32 %v212_v1, %v250_v21 }
  0xa9   : > { %v225_v24 = vpop.xlane.xlu0 %224  ;;  %v231_v25 = vpop.xlane.xlu1 %230 }
  0xaa   : > { %v249_v26 = vmul.f32 0.03125, %v225_v24  ;;  %v251_v27 = vmul.f32 0.03125, %v231_v25  ;;  %v266_v28 = vmul.f32 %v754_v22, %v754_v22  ;;  %v268_v29 = vmul.f32 %v756_v23, %v756_v23 }
  0xac   : > { %v762_v30 = vsub.f32 %v211_v2, %v249_v26  ;;  %v764_v31 = vsub.f32 %v213_v5, %v251_v27  ;;  %v275_v32 = vsel %vm219_vm0, %v266_v28, 0.0  ;;  %v281_v35 = vsel %vm219_vm0, %v268_v29, 0.0  ;;  %v808_v27 = vld [vmem:[%s877_s2] ss:$0 sm:$0xff] }
  0xad   : > { %276 = vadd.xlane.f32.xlu1 %v275_v32  ;;  %v234_v33 = vpop.xlane.xlu0 %233  ;;  %v237_v34 = vpop.xlane.xlu1 %236 }
  0xae   : > { %v252_v36 = vmul.f32 0.03125, %v234_v33  ;;  %v253_v37 = vmul.f32 0.03125, %v237_v34  ;;  %v267_v38 = vmul.f32 %v762_v30, %v762_v30  ;;  %v269_v39 = vmul.f32 %v764_v31, %v764_v31 }
  0xb0   : > { %v772_v40 = vsub.f32 %v214_v8, %v252_v36  ;;  %v774_v41 = vsub.f32 %v215_v9, %v253_v37  ;;  %v278_v42 = vsel %vm219_vm0, %v267_v38, 0.0  ;;  %v284_v45 = vsel %vm219_vm0, %v269_v39, 0.0 }
  0xb1   : > { %282 = vadd.xlane.f32.xlu1 %v281_v35  ;;  %279 = vadd.xlane.f32.xlu0 %v278_v42  ;;  %v240_v43 = vpop.xlane.xlu0 %239  ;;  %v243_v44 = vpop.xlane.xlu1 %242 }
  0xb2   : > { %v254_v46 = vmul.f32 0.03125, %v240_v43  ;;  %v255_v47 = vmul.f32 0.03125, %v243_v44  ;;  %v270_v48 = vmul.f32 %v772_v40, %v772_v40  ;;  %v271_v49 = vmul.f32 %v774_v41, %v774_v41 }
  0xb4   : > { %v782_v50 = vsub.f32 %v216_v12, %v254_v46  ;;  %v784_v51 = vsub.f32 %v217_v13, %v255_v47  ;;  %v287_v52 = vsel %vm219_vm0, %v270_v48, 0.0  ;;  %v290_v55 = vsel %vm219_vm0, %v271_v49, 0.0 }
  0xb5   : > { %285 = vadd.xlane.f32.xlu0 %v284_v45  ;;  %288 = vadd.xlane.f32.xlu1 %v287_v52  ;;  %v246_v53 = vpop.xlane.xlu0 %245 }
  0xb6   : > { %v256_v54 = vmul.f32 0.03125, %v246_v53  ;;  %v272_v56 = vmul.f32 %v782_v50, %v782_v50  ;;  %v273_v57 = vmul.f32 %v784_v51, %v784_v51 }
  0xb8   : > { %v792_v58 = vsub.f32 %v218_v16, %v256_v54  ;;  %v293_v59 = vsel %vm219_vm0, %v272_v56, 0.0  ;;  %v296_v60 = vsel %vm219_vm0, %v273_v57, 0.0 }
  0xb9   : > { %291 = vadd.xlane.f32.xlu0 %v290_v55  ;;  %294 = vadd.xlane.f32.xlu1 %v293_v59 }
  0xba   : > { %v274_v61 = vmul.f32 %v792_v58, %v792_v58 }
  0xbc   : > { %v299_v62 = vsel %vm219_vm0, %v274_v61, 0.0 }
  0xbd   : > { %297 = vadd.xlane.f32.xlu0 %v296_v60  ;;  %300 = vadd.xlane.f32.xlu1 %v299_v62 }
 0x13a   : > { %v277_v63 = vpop.xlane.xlu1 %276 }
 0x13b   : > { %v302_v0 = vmul.f32 0.03125, %v277_v63 }
 0x13d   : > { %v311_v1 = vadd.f32 1e-10, %v302_v0 }
 0x13e   : > { %v283_v2 = vpop.xlane.xlu1 %282  ;;  %v280_v3 = vpop.xlane.xlu0 %279 }
 0x13f   : > { %631 = vrsqrt.f32 %v311_v1  ;;  %v304_v4 = vmul.f32 0.03125, %v283_v2  ;;  %v303_v5 = vmul.f32 0.03125, %v280_v3 }
 0x141   : > { %v313_v6 = vadd.f32 1e-10, %v304_v4  ;;  %v312_v7 = vadd.f32 1e-10, %v303_v5 }
 0x142   : > { %v289_v8 = vpop.xlane.xlu1 %288  ;;  %v286_v9 = vpop.xlane.xlu0 %285 }
 0x143   : > { %633 = vrsqrt.f32 %v313_v6  ;;  %v306_v10 = vmul.f32 0.03125, %v289_v8  ;;  %v305_v11 = vmul.f32 0.03125, %v286_v9 }
 0x144   : > { %635 = vrsqrt.f32 %v312_v7 }
 0x145   : > { %v315_v12 = vadd.f32 1e-10, %v306_v10  ;;  %v314_v13 = vadd.f32 1e-10, %v305_v11 }
 0x146   : > { %v295_v14 = vpop.xlane.xlu1 %294  ;;  %v292_v15 = vpop.xlane.xlu0 %291 }
 0x147   : > { %637 = vrsqrt.f32 %v315_v12  ;;  %v308_v16 = vmul.f32 0.03125, %v295_v14  ;;  %v307_v17 = vmul.f32 0.03125, %v292_v15 }
 0x148   : > { %639 = vrsqrt.f32 %v314_v13 }
 0x149   : > { %v632_v18 = vpop.eup %631  ;;  %v317_v20 = vadd.f32 1e-10, %v308_v16  ;;  %v316_v21 = vadd.f32 1e-10, %v307_v17 }
 0x14a   : > { %v329_v24 = vmul.f32 %v632_v18, %v754_v22  ;;  %v301_v25 = vpop.xlane.xlu1 %300  ;;  %v298_v26 = vpop.xlane.xlu0 %297 }
 0x14b   : > { %641 = vrsqrt.f32 %v317_v20  ;;  %v310_v28 = vmul.f32 0.03125, %v301_v25  ;;  %v309_v29 = vmul.f32 0.03125, %v298_v26 }
 0x14c   : > { %v345_v32 = vmul.f32 %v802_v19, %v329_v24  ;;  %643 = vrsqrt.f32 %v316_v21 }
 0x14d   : > { %v634_v33 = vpop.eup %633  ;;  %v319_v34 = vadd.f32 1e-10, %v310_v28  ;;  %v318_v35 = vadd.f32 1e-10, %v309_v29 }
 0x14e   : > { %v636_v36 = vpop.eup %635  ;;  %v361_v22 = vadd.f32 %v808_v27, %v345_v32  ;;  %v331_v37 = vmul.f32 %v634_v33, %v756_v23 }
 0x14f   : > { %v330_v38 = vmul.f32 %v636_v36, %v762_v30  ;;  %645 = vrsqrt.f32 %v319_v34 }
 0x150   : > { %vm370_vm1 = vcmp.ne.f32.partialorder %v361_v22, %v361_v22  ;;  %v347_v39 = vmul.f32 %v802_v19, %v331_v37  ;;  %647 = vrsqrt.f32 %v318_v35 }
 0x151   : > { %v638_v42 = vpop.eup %637  ;;  %v379_v43 = vsel %vm370_vm1, 0.0, %v361_v22  ;;  %v346_v44 = vmul.f32 %v802_v19, %v330_v38 }
 0x152   : > { %v640_v45 = vpop.eup %639  ;;  %vm388_vm2 = vcmp.eq.f32.partialorder %v379_v43, inf  ;;  %v363_v46 = vadd.f32 %v808_v27, %v347_v39  ;;  %v333_v47 = vmul.f32 %v638_v42, %v772_v40 }
 0x153   : > { %v397_v48 = vsel %vm388_vm2, 3.3895314e+38, %v379_v43  ;;  %v362_v23 = vadd.f32 %v808_v27, %v346_v44  ;;  %v332_v30 = vmul.f32 %v640_v45, %v764_v31 }
 0x154   : > { %vm406_vm4 = vcmp.eq.f32.partialorder %v397_v48, -inf  ;;  %vm372_vm5 = vcmp.ne.f32.partialorder %v363_v46, %v363_v46  ;;  %v349_v49 = vmul.f32 %v802_v19, %v333_v47 }
 0x155   : > { %v642_v52 = vpop.eup %641  ;;  %v415_v53 = vsel %vm406_vm4, -3.3895314e+38, %v397_v48  ;;  %v381_v54 = vsel %vm372_vm5, 0.0, %v363_v46  ;;  %vm371_vm6 = vcmp.ne.f32.partialorder %v362_v23, %v362_v23  ;;  %v348_v40 = vmul.f32 %v802_v19, %v332_v30 }
 0x156   : > { %v644_v55 = vpop.eup %643  ;;  %v581_v56 = vpack.c.bf16 %v415_v53, %v415_v53  ;;  %vm390_vm7 = vcmp.eq.f32.partialorder %v381_v54, inf  ;;  %v380_v31 = vsel %vm371_vm6, 0.0, %v362_v23  ;;  %v365_v57 = vadd.f32 %v808_v27, %v349_v49 }
 0x157   : > { %v399_v59 = vsel %vm390_vm7, 3.3895314e+38, %v381_v54  ;;  %vm389_vm8 = vcmp.eq.f32.partialorder %v380_v31, inf  ;;  %v364_v60 = vadd.f32 %v808_v27, %v348_v40  ;;  %v335_v61 = vmul.f32 %v642_v52, %v782_v50 }
 0x158   : > { %462 = vst.msk [vmem:[%s825_s6] sm:$0xf] %vm461_vm3, %v581_v56  ;;  %vm408_vm9 = vcmp.eq.f32.partialorder %v399_v59, -inf  ;;  %v398_v62 = vsel %vm389_vm8, 3.3895314e+38, %v380_v31  ;;  %vm374_vm10 = vcmp.ne.f32.partialorder %v365_v57, %v365_v57  ;;  %v334_v63 = vmul.f32 %v644_v55, %v774_v41 }
 0x159   : > { %v646_v0 = vpop.eup %645  ;;  %v417_v1 = vsel %vm408_vm9, -3.3895314e+38, %v399_v59  ;;  %vm407_vm11 = vcmp.eq.f32.partialorder %v398_v62, -inf  ;;  %v383_v2 = vsel %vm374_vm10, 0.0, %v365_v57  ;;  %vm373_vm12 = vcmp.ne.f32.partialorder %v364_v60, %v364_v60 }
 0x15a   : > { %v648_v3 = vpop.eup %647  ;;  %v583_v4 = vpack.c.bf16 %v417_v1, %v417_v1  ;;  %v416_v5 = vsel %vm407_vm11, -3.3895314e+38, %v398_v62  ;;  %vm392_vm13 = vcmp.eq.f32.partialorder %v383_v2, inf  ;;  %v382_v6 = vsel %vm373_vm12, 0.0, %v364_v60 }
 0x15b   : > { %v582_v50 = vpack.c.bf16 %v416_v5, %v416_v5  ;;  %v401_v7 = vsel %vm392_vm13, 3.3895314e+38, %v383_v2  ;;  %vm391_vm14 = vcmp.eq.f32.partialorder %v382_v6, inf  ;;  %v351_v8 = vmul.f32 %v802_v19, %v335_v61 }
 0x15c   : > { %464 = vst.msk [vmem:[%s825_s6 + $0x8] sm:$0xf] %vm461_vm3, %v583_v4  ;;  %vm410_vm15 = vcmp.eq.f32.partialorder %v401_v7, -inf  ;;  %v400_v41 = vsel %vm391_vm14, 3.3895314e+38, %v382_v6  ;;  %v350_v9 = vmul.f32 %v802_v19, %v334_v63  ;;  %v337_v10 = vmul.f32 %v646_v0, %v792_v58 }
 0x15d   : > { %463 = vst.msk [vmem:[%s825_s6 + $0x4] sm:$0xf] %vm461_vm3, %v582_v50  ;;  %v419_v11 = vsel %vm410_vm15, -3.3895314e+38, %v401_v7  ;;  %vm409_vm0 = vcmp.eq.f32.partialorder %v400_v41, -inf  ;;  %v367_v12 = vadd.f32 %v808_v27, %v351_v8  ;;  %v336_v13 = vmul.f32 %v648_v3, %v784_v51 }
 0x15e   : > { %v585_v14 = vpack.c.bf16 %v419_v11, %v419_v11  ;;  %v418_v15 = vsel %vm409_vm0, -3.3895314e+38, %v400_v41  ;;  %v366_v16 = vadd.f32 %v808_v27, %v350_v9  ;;  %v353_v17 = vmul.f32 %v802_v19, %v337_v10 }
 0x15f   : > { %v584_v18 = vpack.c.bf16 %v418_v15, %v418_v15  ;;  %vm376_vm1 = vcmp.ne.f32.partialorder %v367_v12, %v367_v12  ;;  %v352_v20 = vmul.f32 %v802_v19, %v336_v13 }
 0x160   : > { %466 = vst.msk [vmem:[%s825_s6 + $0x10] sm:$0xf] %vm461_vm3, %v585_v14  ;;  %v385_v58 = vsel %vm376_vm1, 0.0, %v367_v12  ;;  %vm375_vm2 = vcmp.ne.f32.partialorder %v366_v16, %v366_v16  ;;  %v369_v21 = vadd.f32 %v808_v27, %v353_v17 }
 0x161   : > { %465 = vst.msk [vmem:[%s825_s6 + $0xc] sm:$0xf] %vm461_vm3, %v584_v18  ;;  %vm394_vm4 = vcmp.eq.f32.partialorder %v385_v58, inf  ;;  %v384_v51 = vsel %vm375_vm2, 0.0, %v366_v16  ;;  %v368_v24 = vadd.f32 %v808_v27, %v352_v20 }
 0x162   : > { %v403_v25 = vsel %vm394_vm4, 3.3895314e+38, %v385_v58  ;;  %vm393_vm5 = vcmp.eq.f32.partialorder %v384_v51, inf  ;;  %vm378_vm6 = vcmp.ne.f32.partialorder %v369_v21, %v369_v21 }
 0x163   : > { %vm412_vm7 = vcmp.eq.f32.partialorder %v403_v25, -inf  ;;  %v402_v26 = vsel %vm393_vm5, 3.3895314e+38, %v384_v51  ;;  %v387_v28 = vsel %vm378_vm6, 0.0, %v369_v21  ;;  %vm377_vm8 = vcmp.ne.f32.partialorder %v368_v24, %v368_v24 }
 0x164   : > { %v421_v19 = vsel %vm412_vm7, -3.3895314e+38, %v403_v25  ;;  %vm411_vm9 = vcmp.eq.f32.partialorder %v402_v26, -inf  ;;  %vm396_vm10 = vcmp.eq.f32.partialorder %v387_v28, inf  ;;  %v386_v29 = vsel %vm377_vm8, 0.0, %v368_v24 }
 0x165   : > { %v587_v32 = vpack.c.bf16 %v421_v19, %v421_v19  ;;  %v420_v33 = vsel %vm411_vm9, -3.3895314e+38, %v402_v26  ;;  %v405_v34 = vsel %vm396_vm10, 3.3895314e+38, %v387_v28  ;;  %vm395_vm11 = vcmp.eq.f32.partialorder %v386_v29, inf }
 0x166   : > { %v586_v27 = vpack.c.bf16 %v420_v33, %v420_v33  ;;  %vm414_vm12 = vcmp.eq.f32.partialorder %v405_v34, -inf  ;;  %v404_v35 = vsel %vm395_vm11, 3.3895314e+38, %v386_v29 }
 0x167   : > { %468 = vst.msk [vmem:[%s825_s6 + $0x18] sm:$0xf] %vm461_vm3, %v587_v32  ;;  %v423_v36 = vsel %vm414_vm12, -3.3895314e+38, %v405_v34  ;;  %vm413_vm13 = vcmp.eq.f32.partialorder %v404_v35, -inf }
 0x168   : > { %467 = vst.msk [vmem:[%s825_s6 + $0x14] sm:$0xf] %vm461_vm3, %v586_v27  ;;  %v589_v22 = vpack.c.bf16 %v423_v36, %v423_v36  ;;  %v422_v37 = vsel %vm413_vm13, -3.3895314e+38, %v404_v35 }
 0x169   : > { %v588_v38 = vpack.c.bf16 %v422_v37, %v422_v37 }
 0x16a   : > { %470 = vst.msk [vmem:[%s825_s6 + $0x20] sm:$0xf] %vm461_vm3, %v589_v22 }
 0x16b   : > { %469 = vst.msk [vmem:[%s825_s6 + $0x1c] sm:$0xf] %vm461_vm3, %v588_v38 }
 0x16c PF: > { %s13_s16 = sadd.s32 1, %s687_s16   ;;  %s879_s12 = smov %s679_s14 }
 0x16d   : > { %p10_p7 = scmp.ge.s32.totalorder %s13_s16, 8   ;;  %s880_s13 = smov %s683_s15 }
 0x16e   : > { %s881_s14 = smov %s884_s17  ;;  %s882_s15 = smov %s888_s18 }
 0x16f   :  { %12 = sbr.rel (!%p10_p7) target bundleno = 3 (0x3), region = 62 }

</bundles_post_ra>
